<compile_context>
chip_gen: v7x
topology: tpu7x:2x2x1
jax: 0.10.0
libtpu: 0.0.40
codegen_flags: <defaults>
</compile_context>

<pallas_src>
import functools

import jax
import jax.numpy as jnp
from jax import lax
from jax.experimental import pallas as pl
from jax.experimental.pallas import tpu as pltpu


def bert_embedding_kernel(tok_ids_smem,     # (B, S) int32, SMEM (scalar prefetch)
                          seg_ids_ref,      # (1, TILE_S, 1) int32 tile
                          tok_tab_hbm,      # (vocab, D) f32, HBM ref (pl.ANY)
                          pos_ref,          # (TILE_S, D) f32 positional rows for this seq tile
                          seg_rows_ref,     # (n_seg, D) f32 = pos_table[:n_seg], resident
                          gamma_ref,        # (1, D) f32
                          beta_ref,         # (1, D) f32
                          out_ref,          # (1, TILE_S, D) f32
                          tok_rows,         # (2*TILE_S, D) f32 scratch: double-buffered gather dst
                          gather_sem,       # (2,) DMA semaphores, one per buffer slot
                          *, eps, tile_s, n_seg):
    s = pl.program_id(0)            # sequence-tile index (outer, "parallel")
    b = pl.program_id(1)            # batch index         (inner, "arbitrary")
    num_b = pl.num_programs(1)
    slot = b % 2                    # which scratch half / semaphore this step consumes

    def issue_gather(batch_idx, slot_idx):
        # One DMA per token row: tok_table[ids[batch_idx, s*tile_s + t]] -> scratch row.
        base = slot_idx * tile_s
        s0 = s * tile_s

        @pl.loop(0, tile_s)
        def _(t):
            row = tok_ids_smem[batch_idx, s0 + t]          # scalar SMEM read (data-dependent)
            pltpu.make_async_copy(
                tok_tab_hbm.at[pl.ds(row, 1)],             # (1, D) row in HBM
                tok_rows.at[pl.ds(base + t, 1)],           # (1, D) row in VMEM scratch
                gather_sem.at[slot_idx],
            ).start()

    def wait_gather(slot_idx):
        base = slot_idx * tile_s

        @pl.loop(0, tile_s)
        def _(t):
            # Fresh per-row descriptor: each wait consumes one row-copy completion.
            pltpu.make_async_copy(
                tok_tab_hbm.at[pl.ds(0, 1)],
                tok_rows.at[pl.ds(base, 1)],
                gather_sem.at[slot_idx],
            ).wait()

    # Prime: the first batch element of every seq-tile row fetches its own token rows.
    @pl.when(b == 0)
    def _():
        issue_gather(0, 0)

    # Prefetch the NEXT batch element's rows into the other buffer while this step computes.
    @pl.when(b + 1 < num_b)
    def _():
        issue_gather(b + 1, 1 - slot)

    # --- VPU work that does not depend on the gathered rows (overlaps the DMAs) ---
    # Segment term: pos_emb(seg) with seg in [0, n_seg) -> cheap select over n_seg rows.
    seg_col = seg_ids_ref[0]                               # (TILE_S, 1) int32
    seg_term = seg_rows_ref[0:1, :]                        # (1, D): row for seg id 0
    for k in range(1, n_seg):                              # n_seg is tiny (2-3): unrolled selects
        seg_term = jnp.where(seg_col == k, seg_rows_ref[k:k + 1, :], seg_term)
    pos_seg = pos_ref[...] + seg_term                      # (TILE_S, D)

    # --- Wait for this step's token rows, finish the embedding sum ---
    wait_gather(slot)
    base = pl.multiple_of(slot * tile_s, 8)
    e = tok_rows[pl.ds(base, tile_s), :] + pos_seg         # (TILE_S, D)

    # LayerNorm over d_model (two-pass variance: no catastrophic cancellation).
    mu = jnp.mean(e, axis=-1, keepdims=True)
    d = e - mu
    var = jnp.mean(d * d, axis=-1, keepdims=True)
    y = d * lax.rsqrt(var + eps)
    y = y * gamma_ref[...] + beta_ref[...]

    out_ref[0] = y.astype(out_ref.dtype)                   # one lane-dense (TILE_S, D) store


def bert_embedding(tok_ids, seg_ids, tok_table, pos_table, gamma, beta,
                   *, n_seg=2, eps=1e-5, tile_s=None):
    """BERTEmbedding.forward.  tok_ids/seg_ids: (B, S) int; ids must be in-range."""
    B, S = tok_ids.shape
    vocab_size, d_model = tok_table.shape
    max_len, _ = pos_table.shape
    assert S <= max_len, "sequence longer than positional table"

    if tile_s is None:
        tile_s = min(S, 512)        # HBM-bound now: bigger tiles amortize per-step overhead
    assert S % tile_s == 0 and tile_s % 8 == 0

    tok_ids_i32 = tok_ids.astype(jnp.int32)                 # -> SMEM via scalar prefetch
    seg_ids3 = seg_ids.astype(jnp.int32)[..., None]         # (B, S, 1): sublane-oriented ids
    tok_table = tok_table.astype(jnp.float32)               # stays in HBM (pl.ANY)
    pos_table = pos_table.astype(jnp.float32)
    seg_rows = pos_table[:n_seg]                             # (n_seg, D): tiny resident block
    gamma2d = gamma.reshape(1, d_model).astype(jnp.float32)
    beta2d = beta.reshape(1, d_model).astype(jnp.float32)

    kernel = functools.partial(bert_embedding_kernel, eps=eps, tile_s=tile_s, n_seg=n_seg)
    num_s = S // tile_s

    return pl.pallas_call(
        kernel,
        out_shape=jax.ShapeDtypeStruct((B, S, d_model), jnp.float32),
        grid_spec=pltpu.PrefetchScalarGridSpec(
            num_scalar_prefetch=1,                           # token ids -> SMEM
            grid=(num_s, B),                                 # seq-tile outer, batch inner
            in_specs=[
                # segment ids: (tile_s, 1) column per step (sublane-oriented for the select)
                pl.BlockSpec((1, tile_s, 1), lambda s, b, ids: (b, s, 0)),
                # token table: HBM-resident, gathered row-by-row with manual DMA
                pl.BlockSpec(memory_space=pl.ANY),
                # positional rows: block index constant across the inner batch axis,
                # so Pallas skips the re-fetch for b > 0
                pl.BlockSpec((tile_s, d_model), lambda s, b, ids: (s, 0)),
                # tiny constant blocks (KB-scale; double-buffering them is negligible now)
                pl.BlockSpec((n_seg, d_model), lambda s, b, ids: (0, 0)),
                pl.BlockSpec((1, d_model), lambda s, b, ids: (0, 0)),
                pl.BlockSpec((1, d_model), lambda s, b, ids: (0, 0)),
            ],
            out_specs=pl.BlockSpec((1, tile_s, d_model), lambda s, b, ids: (b, s, 0)),
            scratch_shapes=[
                pltpu.VMEM((2 * tile_s, d_model), jnp.float32),   # double-buffered gather dst
                pltpu.SemaphoreType.DMA((2,)),
            ],
        ),
        compiler_params=pltpu.CompilerParams(
            # Outer seq-tile axis can be split across TensorCores (v7x); the inner
            # batch axis must run in-order per core because the gather pipeline is
            # primed at b == 0, hence "arbitrary".
            dimension_semantics=("parallel", "arbitrary"),
        ),
    )(tok_ids_i32, seg_ids3, tok_table, pos_table, seg_rows, gamma2d, beta2d)


def bert_embedding_ref(tok_ids, seg_ids, tok_table, pos_table, gamma, beta, eps=1e-5):
    B, S = tok_ids.shape
    pos = jnp.broadcast_to(jnp.arange(S, dtype=jnp.int32)[None, :], (B, S))
    emb = tok_table[tok_ids] + pos_table[pos] + pos_table[seg_ids]
    mu = jnp.mean(emb, axis=-1, keepdims=True)
    var = jnp.mean((emb - mu) ** 2, axis=-1, keepdims=True)
    return (emb - mu) * lax.rsqrt(var + eps) * gamma + beta


if __name__ == "__main__":
    # Small shapes consistent with the module's forward.
    B, S = 2, 8
    vocab_size, d_model, max_len, n_seg = 32, 128, 16, 2

    key = jax.random.PRNGKey(0)
    k_tok, k_pos, k_x, k_seg = jax.random.split(key, 4)

    # Deterministic parameters (nn.Embedding ~ N(0,1); LayerNorm gamma=1, beta=0).
    tok_table = jax.random.normal(k_tok, (vocab_size, d_model), dtype=jnp.float32)
    pos_table = jax.random.normal(k_pos, (max_len, d_model), dtype=jnp.float32)
    gamma = jnp.ones((d_model,), dtype=jnp.float32)
    beta = jnp.zeros((d_model,), dtype=jnp.float32)

    x = jax.random.randint(k_x, (B, S), 0, vocab_size, dtype=jnp.int32)
    seg = jax.random.randint(k_seg, (B, S), 0, n_seg, dtype=jnp.int32)

    out = bert_embedding(x, seg, tok_table, pos_table, gamma, beta, n_seg=n_seg)
    out = jax.block_until_ready(out)

    ref = bert_embedding_ref(x, seg, tok_table, pos_table, gamma, beta)
    assert out.shape == (B, S, d_model)
    assert jnp.allclose(out, ref, atol=1e-4, rtol=1e-4), float(jnp.max(jnp.abs(out - ref)))

    print("KERNEL_OK")
</pallas_src>

<mosaic_0001>
module attributes {stable_mosaic.version = 11 : i64} {
  func.func @bert_embedding_kernel(%arg0: i32, %arg1: i32, %arg2: memref<2x8xi32, #tpu.memory_space<smem>>, %arg3: memref<1x8x1xi32, #tpu.memory_space<vmem>>, %arg4: memref<32x128xf32, #tpu.memory_space<any>>, %arg5: memref<8x128xf32, #tpu.memory_space<vmem>>, %arg6: memref<2x128xf32, #tpu.memory_space<vmem>>, %arg7: memref<1x128xf32, #tpu.memory_space<vmem>>, %arg8: memref<1x128xf32, #tpu.memory_space<vmem>>, %arg9: memref<1x8x128xf32, #tpu.memory_space<vmem>>, %arg10: memref<16x128xf32, #tpu.memory_space<vmem>>, %arg11: memref<2x!tpu.dma_semaphore, #tpu.memory_space<semaphore_mem>>) attributes {dimension_semantics = [#tpu.dimension_semantics<parallel>, #tpu.dimension_semantics<arbitrary>], iteration_bounds = array<i64: 1, 2>, scalar_prefetch = 1 : i64, scratch_operands = 2 : i64, tpu.core_type = #tpu.core_type<tc>, window_params = [{transform_indices = @transform_0, window_bounds = array<i64: 1, 8, 1>}, {}, {transform_indices = @transform_2, window_bounds = array<i64: 8, 128>}, {pipeline_mode = #tpu.pipeline_mode<synchronous>, transform_indices = @transform_3, window_bounds = array<i64: 2, 128>}, {pipeline_mode = #tpu.pipeline_mode<synchronous>, transform_indices = @transform_4, window_bounds = array<i64: 1, 128>}, {pipeline_mode = #tpu.pipeline_mode<synchronous>, transform_indices = @transform_5, window_bounds = array<i64: 1, 128>}, {transform_indices = @transform_6, window_bounds = array<i64: 1, 8, 128>}]} {
    %c2_i32 = arith.constant 2 : i32
    %c0_i32 = arith.constant 0 : i32
    %0 = arith.cmpi eq, %c2_i32, %c0_i32 : i32
    %c1_i32 = arith.constant 1 : i32
    %1 = arith.select %0, %c1_i32, %c2_i32 : i32
    %2 = arith.remsi %arg1, %1 : i32
    %c0_i32_0 = arith.constant 0 : i32
    %3 = arith.cmpi ne, %2, %c0_i32_0 : i32
    %c0_i32_1 = arith.constant 0 : i32
    %4 = arith.cmpi slt, %2, %c0_i32_1 : i32
    %c0_i32_2 = arith.constant 0 : i32
    %5 = arith.cmpi slt, %1, %c0_i32_2 : i32
    %6 = arith.xori %4, %5 : i1
    %7 = arith.andi %6, %3 : i1
    %8 = arith.addi %2, %1 : i32
    %9 = arith.select %7, %8, %2 : i32
    %c0_i32_3 = arith.constant 0 : i32
    %10 = arith.cmpi eq, %arg1, %c0_i32_3 : i32
    %11 = arith.extui %10 : i1 to i32
    %c0_i32_4 = arith.constant 0 : i32
    %12 = arith.cmpi ne, %11, %c0_i32_4 : i32
    scf.if %12 {
      %c8_i32_32 = arith.constant 8 : i32
      %64 = arith.muli %arg0, %c8_i32_32 : i32
      %c0_i32_33 = arith.constant 0 : i32
      %c8_i32_34 = arith.constant 8 : i32
      %65 = arith.addi %c0_i32_33, %c8_i32_34 : i32
      %c1_i32_35 = arith.constant 1 : i32
      scf.for %arg12 = %c0_i32_33 to %65 step %c1_i32_35  : i32 {
        %c1_i32_37 = arith.constant 1 : i32
        %66 = arith.muli %arg12, %c1_i32_37 : i32
        %c0_i32_38 = arith.constant 0 : i32
        %67 = arith.addi %c0_i32_38, %66 : i32
        %68 = arith.addi %64, %67 : i32
        %c0_39 = arith.constant 0 : index
        %69 = arith.index_cast %68 : i32 to index
        %70 = memref.load %arg2[%c0_39, %69] : memref<2x8xi32, #tpu.memory_space<smem>>
        %c0_i32_40 = arith.constant 0 : i32
        %71 = arith.addi %c0_i32_40, %67 : i32
        %c0_i32_41 = arith.constant 0 : i32
        %c0_i32_42 = arith.constant 0 : i32
        %72 = tpu.memref_slice %arg4[%70, %c0_i32_42] : memref<32x128xf32, #tpu.memory_space<any>> -> memref<1x128xf32, #tpu.memory_space<any>>
        %c0_i32_43 = arith.constant 0 : i32
        %73 = tpu.memref_slice %arg10[%71, %c0_i32_43] : memref<16x128xf32, #tpu.memory_space<vmem>> -> memref<1x128xf32, #tpu.memory_space<vmem>>
        %74 = tpu.memref_slice %arg11[%c0_i32_41] : memref<2x!tpu.dma_semaphore, #tpu.memory_space<semaphore_mem>> -> memref<1x!tpu.dma_semaphore, #tpu.memory_space<semaphore_mem>>
        %75 = tpu.memref_squeeze %74 : memref<1x!tpu.dma_semaphore, #tpu.memory_space<semaphore_mem>> -> memref<!tpu.dma_semaphore, #tpu.memory_space<semaphore_mem>>
        tpu.enqueue_dma source(%72 : memref<1x128xf32, #tpu.memory_space<any>>) target(%73 : memref<1x128xf32, #tpu.memory_space<vmem>>) target_semaphore(%75 : memref<!tpu.dma_semaphore, #tpu.memory_space<semaphore_mem>>)
      }
      %c8_i32_36 = arith.constant 8 : i32
    } else {
    }
    %c1_i32_5 = arith.constant 1 : i32
    %13 = arith.addi %arg1, %c1_i32_5 : i32
    %c2_i32_6 = arith.constant 2 : i32
    %14 = arith.cmpi slt, %13, %c2_i32_6 : i32
    %15 = arith.extui %14 : i1 to i32
    %c0_i32_7 = arith.constant 0 : i32
    %16 = arith.cmpi ne, %15, %c0_i32_7 : i32
    scf.if %16 {
      %c1_i32_32 = arith.constant 1 : i32
      %64 = arith.addi %arg1, %c1_i32_32 : i32
      %c1_i32_33 = arith.constant 1 : i32
      %65 = arith.subi %c1_i32_33, %9 : i32
      %c8_i32_34 = arith.constant 8 : i32
      %66 = arith.muli %65, %c8_i32_34 : i32
      %c8_i32_35 = arith.constant 8 : i32
      %67 = arith.muli %arg0, %c8_i32_35 : i32
      %c0_i32_36 = arith.constant 0 : i32
      %c8_i32_37 = arith.constant 8 : i32
      %68 = arith.addi %c0_i32_36, %c8_i32_37 : i32
      %c1_i32_38 = arith.constant 1 : i32
      scf.for %arg12 = %c0_i32_36 to %68 step %c1_i32_38  : i32 {
        %c1_i32_40 = arith.constant 1 : i32
        %69 = arith.muli %arg12, %c1_i32_40 : i32
        %c0_i32_41 = arith.constant 0 : i32
        %70 = arith.addi %c0_i32_41, %69 : i32
        %71 = arith.addi %67, %70 : i32
        %72 = arith.index_cast %64 : i32 to index
        %73 = arith.index_cast %71 : i32 to index
        %74 = memref.load %arg2[%72, %73] : memref<2x8xi32, #tpu.memory_space<smem>>
        %75 = arith.addi %66, %70 : i32
        %c0_i32_42 = arith.constant 0 : i32
        %76 = tpu.memref_slice %arg4[%74, %c0_i32_42] : memref<32x128xf32, #tpu.memory_space<any>> -> memref<1x128xf32, #tpu.memory_space<any>>
        %c0_i32_43 = arith.constant 0 : i32
        %77 = tpu.memref_slice %arg10[%75, %c0_i32_43] : memref<16x128xf32, #tpu.memory_space<vmem>> -> memref<1x128xf32, #tpu.memory_space<vmem>>
        %78 = tpu.memref_slice %arg11[%65] : memref<2x!tpu.dma_semaphore, #tpu.memory_space<semaphore_mem>> -> memref<1x!tpu.dma_semaphore, #tpu.memory_space<semaphore_mem>>
        %79 = tpu.memref_squeeze %78 : memref<1x!tpu.dma_semaphore, #tpu.memory_space<semaphore_mem>> -> memref<!tpu.dma_semaphore, #tpu.memory_space<semaphore_mem>>
        tpu.enqueue_dma source(%76 : memref<1x128xf32, #tpu.memory_space<any>>) target(%77 : memref<1x128xf32, #tpu.memory_space<vmem>>) target_semaphore(%79 : memref<!tpu.dma_semaphore, #tpu.memory_space<semaphore_mem>>)
      }
      %c8_i32_39 = arith.constant 8 : i32
    } else {
    }
    %c0 = arith.constant 0 : index
    %c0_8 = arith.constant 0 : index
    %c0_9 = arith.constant 0 : index
    %17 = vector.load %arg3[%c0, %c0_8, %c0_9] : memref<1x8x1xi32, #tpu.memory_space<vmem>>, vector<1x8x1xi32>
    %18 = vector.shape_cast %17 : vector<1x8x1xi32> to vector<8x1xi32>
    %c0_10 = arith.constant 0 : index
    %c0_11 = arith.constant 0 : index
    %19 = vector.load %arg6[%c0_10, %c0_11] : memref<2x128xf32, #tpu.memory_space<vmem>>, vector<1x128xf32>
    %c1_i32_12 = arith.constant 1 : i32
    %20 = vector.broadcast %c1_i32_12 : i32 to vector<8x1xi32>
    %21 = arith.cmpi eq, %18, %20 : vector<8x1xi32>
    %c1 = arith.constant 1 : index
    %c0_13 = arith.constant 0 : index
    %22 = vector.load %arg6[%c1, %c0_13] : memref<2x128xf32, #tpu.memory_space<vmem>>, vector<1x128xf32>
    %23 = vector.shape_cast %21 : vector<8x1xi1> to vector<8x1xi1>
    %24 = vector.broadcast %23 : vector<8x1xi1> to vector<8x128xi1>
    %25 = vector.shape_cast %22 : vector<1x128xf32> to vector<1x128xf32>
    %26 = vector.broadcast %25 : vector<1x128xf32> to vector<8x128xf32>
    %27 = vector.shape_cast %19 : vector<1x128xf32> to vector<1x128xf32>
    %28 = vector.broadcast %27 : vector<1x128xf32> to vector<8x128xf32>
    %29 = arith.select %24, %26, %28 : vector<8x128xi1>, vector<8x128xf32>
    %c0_14 = arith.constant 0 : index
    %c0_15 = arith.constant 0 : index
    %30 = vector.load %arg5[%c0_14, %c0_15] : memref<8x128xf32, #tpu.memory_space<vmem>>, vector<8x128xf32>
    %31 = arith.addf %30, %29 : vector<8x128xf32>
    %c8_i32 = arith.constant 8 : i32
    %32 = arith.muli %9, %c8_i32 : i32
    %c0_i32_16 = arith.constant 0 : i32
    %c8_i32_17 = arith.constant 8 : i32
    %33 = arith.addi %c0_i32_16, %c8_i32_17 : i32
    %c1_i32_18 = arith.constant 1 : i32
    scf.for %arg12 = %c0_i32_16 to %33 step %c1_i32_18  : i32 {
      %c0_i32_32 = arith.constant 0 : i32
      %c0_i32_33 = arith.constant 0 : i32
      %64 = tpu.memref_slice %arg4[%c0_i32_32, %c0_i32_33] : memref<32x128xf32, #tpu.memory_space<any>> -> memref<1x128xf32, #tpu.memory_space<any>>
      %c0_i32_34 = arith.constant 0 : i32
      %65 = tpu.memref_slice %arg10[%32, %c0_i32_34] : memref<16x128xf32, #tpu.memory_space<vmem>> -> memref<1x128xf32, #tpu.memory_space<vmem>>
      %66 = tpu.memref_slice %arg11[%9] : memref<2x!tpu.dma_semaphore, #tpu.memory_space<semaphore_mem>> -> memref<1x!tpu.dma_semaphore, #tpu.memory_space<semaphore_mem>>
      %67 = tpu.memref_squeeze %66 : memref<1x!tpu.dma_semaphore, #tpu.memory_space<semaphore_mem>> -> memref<!tpu.dma_semaphore, #tpu.memory_space<semaphore_mem>>
      tpu.wait_dma2 semaphore(%67 : memref<!tpu.dma_semaphore, #tpu.memory_space<semaphore_mem>>) src(%64 : memref<1x128xf32, #tpu.memory_space<any>>) dst(%65 : memref<1x128xf32, #tpu.memory_space<vmem>>)
    }
    %c8_i32_19 = arith.constant 8 : i32
    %34 = arith.muli %9, %c8_i32_19 : i32
    %35 = tpu.assume_multiple %34, 8 : i32
    %36 = arith.index_cast %35 : i32 to index
    %c0_20 = arith.constant 0 : index
    %37 = vector.load %arg10[%36, %c0_20] : memref<16x128xf32, #tpu.memory_space<vmem>>, vector<8x128xf32>
    %38 = arith.addf %37, %31 : vector<8x128xf32>
    %cst = arith.constant dense<0.000000e+00> : vector<8xf32>
    %39 = vector.multi_reduction <add>, %38, %cst [1] : vector<8x128xf32> to vector<8xf32>
    %40 = vector.shape_cast %39 : vector<8xf32> to vector<8x1xf32>
    %cst_21 = arith.constant 1.280000e+02 : f32
    %41 = vector.broadcast %cst_21 : f32 to vector<8x1xf32>
    %42 = arith.divf %40, %41 : vector<8x1xf32>
    %43 = vector.broadcast %42 : vector<8x1xf32> to vector<8x128xf32>
    %44 = arith.subf %38, %43 : vector<8x128xf32>
    %45 = arith.mulf %44, %44 : vector<8x128xf32>
    %cst_22 = arith.constant dense<0.000000e+00> : vector<8xf32>
    %46 = vector.multi_reduction <add>, %45, %cst_22 [1] : vector<8x128xf32> to vector<8xf32>
    %47 = vector.shape_cast %46 : vector<8xf32> to vector<8x1xf32>
    %cst_23 = arith.constant 1.280000e+02 : f32
    %48 = vector.broadcast %cst_23 : f32 to vector<8x1xf32>
    %49 = arith.divf %47, %48 : vector<8x1xf32>
    %cst_24 = arith.constant 9.99999974E-6 : f32
    %50 = vector.broadcast %cst_24 : f32 to vector<8x1xf32>
    %51 = arith.addf %49, %50 : vector<8x1xf32>
    %52 = math.rsqrt %51 : vector<8x1xf32>
    %53 = vector.broadcast %52 : vector<8x1xf32> to vector<8x128xf32>
    %54 = arith.mulf %44, %53 : vector<8x128xf32>
    %c0_25 = arith.constant 0 : index
    %c0_26 = arith.constant 0 : index
    %55 = vector.load %arg7[%c0_25, %c0_26] : memref<1x128xf32, #tpu.memory_space<vmem>>, vector<1x128xf32>
    %56 = vector.broadcast %55 : vector<1x128xf32> to vector<8x128xf32>
    %57 = arith.mulf %54, %56 : vector<8x128xf32>
    %c0_27 = arith.constant 0 : index
    %c0_28 = arith.constant 0 : index
    %58 = vector.load %arg8[%c0_27, %c0_28] : memref<1x128xf32, #tpu.memory_space<vmem>>, vector<1x128xf32>
    %59 = vector.broadcast %58 : vector<1x128xf32> to vector<8x128xf32>
    %60 = arith.addf %57, %59 : vector<8x128xf32>
    %c0_29 = arith.constant 0 : index
    %c0_30 = arith.constant 0 : index
    %c0_31 = arith.constant 0 : index
    %61 = vector.load %arg9[%c0_29, %c0_30, %c0_31] : memref<1x8x128xf32, #tpu.memory_space<vmem>>, vector<1x8x128xf32>
    %62 = vector.shape_cast %61 : vector<1x8x128xf32> to vector<8x128xf32>
    %63 = vector.shape_cast %60 : vector<8x128xf32> to vector<1x8x128xf32>
    tpu.vector_store %arg9[%c0_29, %c0_30, %c0_31], %63 {strides = array<i32>} : memref<1x8x128xf32, #tpu.memory_space<vmem>>, vector<1x8x128xf32>,
    return
  }
  func.func @transform_0(%arg0: i32, %arg1: i32, %arg2: memref<2x8xi32, #tpu.memory_space<smem>>) -> (i32, i32, i32) {
    %c0_i32 = arith.constant 0 : i32
    %c0_i32_0 = arith.constant 0 : i32
    return %arg1, %arg0, %c0_i32 : i32, i32, i32
  }
  func.func @transform_2(%arg0: i32, %arg1: i32, %arg2: memref<2x8xi32, #tpu.memory_space<smem>>) -> (i32, i32) {
    %c0_i32 = arith.constant 0 : i32
    %c0_i32_0 = arith.constant 0 : i32
    return %arg0, %c0_i32 : i32, i32
  }
  func.func @transform_3(%arg0: i32, %arg1: i32, %arg2: memref<2x8xi32, #tpu.memory_space<smem>>) -> (i32, i32) {
    %c0_i32 = arith.constant 0 : i32
    %c0_i32_0 = arith.constant 0 : i32
    %c0_i32_1 = arith.constant 0 : i32
    return %c0_i32, %c0_i32_0 : i32, i32
  }
  func.func @transform_4(%arg0: i32, %arg1: i32, %arg2: memref<2x8xi32, #tpu.memory_space<smem>>) -> (i32, i32) {
    %c0_i32 = arith.constant 0 : i32
    %c0_i32_0 = arith.constant 0 : i32
    %c0_i32_1 = arith.constant 0 : i32
    return %c0_i32, %c0_i32_0 : i32, i32
  }
  func.func @transform_5(%arg0: i32, %arg1: i32, %arg2: memref<2x8xi32, #tpu.memory_space<smem>>) -> (i32, i32) {
    %c0_i32 = arith.constant 0 : i32
    %c0_i32_0 = arith.constant 0 : i32
    %c0_i32_1 = arith.constant 0 : i32
    return %c0_i32, %c0_i32_0 : i32, i32
  }
  func.func @transform_6(%arg0: i32, %arg1: i32, %arg2: memref<2x8xi32, #tpu.memory_space<smem>>) -> (i32, i32, i32) {
    %c0_i32 = arith.constant 0 : i32
    %c0_i32_0 = arith.constant 0 : i32
    return %arg1, %arg0, %c0_i32 : i32, i32, i32
  }
}

</mosaic_0001>

<bundles_post_ra>
// kernel: tpu_custom_call.1
= control target key start
LH: loop header
LB: loop body
LE: loop exit
PB: predicated region body
PF: predicated region fallthrough
CT: control target
= control target key end

     0   :  { %s1081_s0 = inlined_call_operand.vmem [shape: s32[2,8], index: 0, kind: input, shape index: {}]   ;;  %s1082_s1 = inlined_call_operand.vmem [shape: s32[2,8,1], index: 1, kind: input, shape index: {}]   ;;  %s1083_s2 = inlined_call_operand.hbm [shape: f32[32,128], index: 2, kind: input, shape index: {}]   ;;  %s1084_s3 = inlined_call_operand.vmem [shape: f32[16,128], index: 3, kind: input, shape index: {}]   ;;  %s1085_s4 = inlined_call_operand.vmem [shape: f32[2,128], index: 4, kind: input, shape index: {}]   ;;  %s1086_s5 = inlined_call_operand.vmem [shape: f32[1,128], index: 5, kind: input, shape index: {}]   ;;  %s1087_s6 = inlined_call_operand.vmem [shape: f32[1,128], index: 6, kind: input, shape index: {}]   ;;  %s1088_s7 = inlined_call_operand.hbm [shape: f32[2,8,128], index: 7, kind: output, shape index: {}]  }
   0x1   :  { %1100 = sst [smem:[#allocation24_spill]] %s1082_s1  ;;  %s12_s26 = sshll.u32 %s1081_s0, 4  ;;  %s13_s26 = int_to_ptr.vmem [resolvable:$true] %s12_s26 }
   0x2   :  { %1101 = sst [smem:[#allocation25_spill]] %s1087_s6  ;;  %s664_s27 = scalar_lea.vmem %s13_s26, 32 }
   0x3   :  { %1102 = sst [smem:[#allocation26_spill]] %s1088_s7  ;;  %p665_p0 = scmp.ne.s32.totalorder %s13_s26, %s664_s27 }
   0x4   :  { %p669_p1 = scmp.lt.s32.totalorder %s13_s26, %s13_s26  ;;  %p670_p2 = scmp.lt.s32.totalorder %s664_s27, %s664_s27 }
   0x6   :  { %p671_p3 = por %p670_p2, %p669_p1 }
   0x8   :  { %p672_p4 = pnand %p671_p3, %p665_p0 }
   0xa   :  { %675 = shalt.err (!%p672_p4)  }
   0xb   :  { %s832_s28 = smov [#allocation5]  }
   0xc   :  { %15 = dma.vmem_to_smem %s13_s26, 32, %s832_s28, [#allocation4] }
   0xd   :  { %788 = dma.done.wait [#allocation4], 32 }
   0xe   :  { %789 = vsyncadd [#allocation4], 4294967264 }
   0xf   :  { %17 = sfence }
  0x10   :  { %18 = vsyncpa [#allocation7], 0 }
  0x11   :  { %20 = vsyncpa [#allocation7 + $0x1], 0  ;;  %s880_s29 = smov 0   ;;  %s882_s30 = smov 0  }
  0x12   :  { %s884_s0 = smov 0   ;;  %s886_s8 = smov 0  }
  0x13   :  { %s888_s9 = smov 0   ;;  %s890_s10 = smov 0  }
  0x14 LB: > { %1103 = sst [smem:[#allocation17_spill]] %s798_s29  ;;  %s552_s11 = sadd.s32 4294967295, %s818_s10   ;;  %s818_s10 = sphi %s890_s10, %s26_s10   ;;  %s814_s9 = sphi %s888_s9, %s1128_s9   ;;  %s810_s8 = sphi %s886_s8, %s1127_s8   ;;  %s806_s0 = sphi %s884_s0, %s1126_s0   ;;  %s802_s30 = sphi %s882_s30, %s1130_s30   ;;  %s798_s29 = sphi %s880_s29, %s1129_s29  }
  0x15   : > { %1104 = sst [smem:[#allocation18_spill]] %s806_s0  ;;  %s553_s12 = sadd.s32 4294967294, %s818_s10  }
  0x16   : > { %1105 = sst [smem:[#allocation19_spill]] %s814_s9  ;;  %s35_s13 = sadd.s32 1, %s814_s9 }
  0x17   : > { %1106 = sst [smem:[#allocation20_spill]] %s818_s10  ;;  %s164_s14 = sadd.s32 1, %s806_s0 }
  0x18   : > { %p36_p5 = scmp.ge.s32.totalorder %s35_s13, 2  ;;  %p174_p6 = scmp.ne.s32.totalorder %s806_s0, %s802_s30 }
  0x19   : > { %p175_p7 = scmp.eq.s32.totalorder %s552_s11, 1  ;;  %p180_p8 = scmp.ne.s32.totalorder %s802_s30, %s798_s29 }
  0x1a   : > { %s1132_s13 = smov (%p36_p5, %s35_s13), 0  ;;  %p181_p10 = scmp.eq.s32.totalorder %s553_s12, 1 }
  0x1b   : > { %1107 = sst [smem:[#allocation21_spill]] %s1132_s13  ;;  %p920_p9 = por %p175_p7, %p174_p6 }
  0x1c   : > { %s159_s16 = ssub.s32 %s814_s9, %s1132_s13  ;;  %p557_p11 = scmp.ge.s32.totalorder %s818_s10, 1 }
  0x1d   : > { %p162_p12 = scmp.eq.s32.totalorder %s159_s16, 0  ;;  %p927_p13 = por %p181_p10, %p180_p8 }
  0x1e   : > { %p225_p0 = scmp.lt.s32.totalorder %s818_s10, 3 }
  0x1f   : > { %s1109_s17 = scalar_select %p927_p13, 1, 0 }
  0x20   : > { %s933_s18 = scalar_select %p162_p12, %s806_s0, %s164_s14  }
  0x21   : > { %1110 = sst [smem:[#allocation22_spill]] %s1109_s17  ;;  %p226_p1 = pnand %p557_p11, %p225_p0 }
  0x22   : > { %1111 = sst [smem:[#allocation23_spill]] %s933_s18  ;;  %s1089_s19 = sand.u32 (!%p226_p1), 1, %s802_s30  }
  0x23   : > { %229 = sbr.rel (%p226_p1) target bundleno = 610 (0x262), region = 40  ;;  %p259_p2 = scmp.lt.s32.totalorder (!%p226_p1), %s810_s8, 1 }
  0x24   : > { %s939_s20 = sshll.u32 (!%p226_p1), %s1089_s19, 3  ;;  %p270_p3 = scmp.lt.s32.totalorder (!%p226_p1), %s810_s8, 0 }
  0x25   : > { %s271_s21 = ssub.s32 (!%p226_p1), 0, %s810_s8  ;;  %s1112_s1 = sld [smem:[#allocation24_spill]] (!%p226_p1) }
  0x26   : > { %s560_s23 = smin.u32 (!%p226_p1), %s810_s8, %s271_s21  ;;  %p563_p5 = scmp.ne.s32.totalorder (!%p226_p1), %s810_s8, 0 }
  0x27   : > { %s273_s25 = sand.u32 (!%p226_p1), 1, %s560_s23  }
  0x28   : > { %s274_s11 = ssub.s32 (!%p226_p1), 0, %s273_s25 }
  0x2a   : > { %s260_s22 = scalar_select %p259_p2, %s810_s8, 1 }
  0x2b   : > { %s1134_s11 = smov (!%p270_p3, %s274_s11), %s273_s25  ;;  %285 = sbr.rel (%p563_p5) target bundleno = 89 (0x59), region = 44 }
  0x2c   : > { %s559_s24 = sshll.u32 %s260_s22, 3  ;;  %p562_p4 = scmp.lt.s32.totalorder %s1134_s11, 0 }
  0x2d   : > { %s948_s28 = scalar_lea.vmem %s1112_s1, %s559_s24  ;;  %s280_s12 = sadd.s32 2, %s1134_s11 }
  0x2e   : > { %s1136_s12 = smov (!%p562_p4, %s280_s12), %s1134_s11  ;;  %s954_s16 = smov (!%p563_p5), 0  }
  0x32 LB: >> { %s294_s21 = sld [smem:[#allocation5 + %s822_s16]]  ;;  %s297_s22 = scalar_lea.vmem [#allocation2], %s822_s16  ;;  %s822_s16 = sphi %s954_s16, %s292_s16  }
  0x33   : >> { %s305_s23 = sshll.u32 %s297_s22, 4  ;;  %s678_s1 = scalar_lea.hbm %s1083_s2, 512  ;;  %s306_s23 = int_to_ptr.vmem [resolvable:$true] %s305_s23 }
  0x38   : >> { %s564_s24 = sshll.u32 %s294_s21, 4 }
  0x39   : >> { %s296_s27 = scalar_lea.hbm %s1083_s2, %s564_s24 }
  0x3a   : >> { %s676_s11 = scalar_lea.hbm %s296_s27, 16  ;;  %p679_p7 = scmp.lt.u32.totalorder %s296_s27, %s1083_s2 }
  0x3b   : >> { %p677_p6 = scmp.ne.s32.totalorder %s296_s27, %s676_s11  ;;  %p680_p8 = scmp.lt.u32.totalorder %s678_s1, %s676_s11 }
  0x3c   : >> { %p682_p11 = scmp.lt.u32.totalorder %s676_s11, %s296_s27 }
  0x3d   : >> { %p681_p10 = por %p680_p8, %p679_p7 }
  0x3f   : >> { %p683_p12 = por %p682_p11, %p681_p10 }
  0x41   : >> { %p684_p0 = pnand %p683_p12, %p677_p6 }
  0x43   : >> { %687 = shalt.err (!%p684_p0)  }
  0x44   : >> { %s688_s21 = scalar_lea.vmem %s306_s23, 16  ;;  %s833_s22 = smov [#allocation2]  }
  0x45   : >> { %p689_p1 = scmp.ne.s32.totalorder %s306_s23, %s688_s21  ;;  %s690_s24 = sshll.u32 %s833_s22, 4  ;;  %s691_s24 = int_to_ptr.vmem [resolvable:$false] %s690_s24 }
  0x46   : >> { %s692_s25 = scalar_lea.vmem %s691_s24, 256  ;;  %p693_p2 = scmp.lt.s32.totalorder %s306_s23, %s691_s24 }
  0x47   : >> { %p694_p3 = scmp.lt.s32.totalorder %s692_s25, %s688_s21 }
  0x49   : >> { %p695_p4 = por %p694_p3, %p693_p2 }
  0x4b   : >> { %p696_p5 = pnand %p695_p4, %p689_p1 }
  0x4d   : >> { %699 = shalt.err (!%p696_p5)  }
  0x4e   : >> { %308 = dma.hbm_to_vmem [thread:$0]  %s296_s27, 16, %s306_s23, [#allocation3] }
  0x4f   : >> { %s292_s16 = sadd.s32 1, %s822_s16  }
  0x50   : >> { %p289_p13 = scmp.ge.s32.totalorder %s292_s16, 8  }
  0x52   : > { %291 = sbr.rel (!%p289_p13) target bundleno = 50 (0x32), region = 123 }
  0x59 PF: > { %s1099_s1 = sadd.s32 1, %s810_s8 }
  0x5a   : > { %p565_p6 = scmp.ge.s32.totalorder %s1099_s1, 2 }
  0x5b   : > { %s1092_s9 = ssub.s32 (!%p565_p6), 1, %s1136_s12  ;;  %s981_s19 = smov (!%p565_p6), 0  }
  0x5c   : > { %313 = sbr.rel (%p565_p6) target bundleno = 143 (0x8f), region = 59  ;;  %s979_s13 = sshll.u32 (!%p565_p6), %s1092_s9, 3 }
  0x63 LB: >> { %s324_s14 = sshra.s32 %s826_s19, 7  ;;  %s329_s16 = sand.u32 127, %s826_s19  ;;  %s826_s19 = sphi %s981_s19, %s322_s19  }
  0x64   : >> { %s1113_s1 = sadd.s32 1, %s810_s8  ;;  %s332_s26 = sadd.s32 %s826_s19, %s979_s13 }
  0x65   : >> { %s326_s23 = sadd.s32 %s324_s14, %s1113_s1  ;;  %s335_s22 = scalar_lea.vmem [#allocation2], %s332_s26 }
  0x66   : >> { %s567_s27 = sshll.u32 %s326_s23, 7  ;;  %s344_s24 = sshll.u32 %s335_s22, 4  ;;  %s345_s24 = int_to_ptr.vmem [resolvable:$true] %s344_s24 }
  0x67   : >> { %s330_s11 = sadd.s32 %s567_s27, %s329_s16  ;;  %s1114_s17 = ssub.s32 1, %s1136_s12 }
  0x68   : >> { %s331_s21 = sld [smem:[#allocation5 + %s330_s11]]  ;;  %s336_s29 = scalar_lea.sflag [#allocation3], %s1114_s17 }
  0x69   : >> { %s702_s14 = scalar_lea.hbm %s1083_s2, 512 }
  0x6e   : >> { %s568_s25 = sshll.u32 %s331_s21, 4 }
  0x6f   : >> { %s334_s0 = scalar_lea.hbm %s1083_s2, %s568_s25 }
  0x70   : >> { %s700_s10 = scalar_lea.hbm %s334_s0, 16  ;;  %p703_p7 = scmp.lt.u32.totalorder %s334_s0, %s1083_s2 }
  0x71   : >> { %p701_p13 = scmp.ne.s32.totalorder %s334_s0, %s700_s10  ;;  %p704_p8 = scmp.lt.u32.totalorder %s702_s14, %s700_s10 }
  0x72   : >> { %p706_p11 = scmp.lt.u32.totalorder %s700_s10, %s334_s0 }
  0x73   : >> { %p705_p10 = por %p704_p8, %p703_p7 }
  0x75   : >> { %p707_p12 = por %p706_p11, %p705_p10 }
  0x77   : >> { %p708_p0 = pnand %p707_p12, %p701_p13 }
  0x79   : >> { %711 = shalt.err (!%p708_p0)  }
  0x7a   : >> { %s712_s18 = scalar_lea.vmem %s345_s24, 16  ;;  %s834_s9 = smov [#allocation2]  }
  0x7b   : >> { %p713_p1 = scmp.ne.s32.totalorder %s345_s24, %s712_s18  ;;  %s714_s17 = sshll.u32 %s834_s9, 4  ;;  %s715_s17 = int_to_ptr.vmem [resolvable:$false] %s714_s17 }
  0x7c   : >> { %s716_s16 = scalar_lea.vmem %s715_s17, 256  ;;  %p717_p2 = scmp.lt.s32.totalorder %s345_s24, %s715_s17 }
  0x7d   : >> { %p718_p3 = scmp.lt.s32.totalorder %s716_s16, %s712_s18 }
  0x7f   : >> { %p719_p4 = por %p718_p3, %p717_p2 }
  0x81   : >> { %p720_p5 = pnand %p719_p4, %p713_p1 }
  0x83   : >> { %723 = shalt.err (!%p720_p5)  }
  0x84   : >> { %347 = dma.hbm_to_vmem [thread:$0]  %s334_s0, 16, %s345_s24, %s336_s29 }
  0x85   : >> { %s322_s19 = sadd.s32 1, %s826_s19  }
  0x86   : >> { %p319_p6 = scmp.ge.s32.totalorder %s322_s19, 8  }
  0x88   : > { %321 = sbr.rel (!%p319_p6) target bundleno = 99 (0x63), region = 134 }
  0x8f PF: > { %v348_v0 = vld [vmem:[%s948_s28] sm:$0xff]  ;;  %v835_v1 = vmov 0   ;;  %s571_s6 = sshll.u32 %s1136_s12, 3  ;;  %s828_s28 = smov 0  }
  0x90   : > { %661 = vset.pattern.permute.xlu0 %v835_v1  ;;  %vm350_vm0 = vcmp.eq.s32.totalorder %v348_v0, 1  ;;  %v570_v3 = vld [vmem:[%s1085_s4] ss:$0 sm:$0xff]  ;;  %v569_v4 = vld [vmem:[%s1085_s4 + $0x1] ss:$0 sm:$0xff] }
  0x91   : > { %v352_v2 = vsel %vm350_vm0, 1, %v835_v1  ;;  %v366_v5 = vld [vmem:[%s1084_s3] sm:$0xff] }
  0x92   : > { %354 = vperm.xlu0 %661, %v352_v2  }
 0x111   : > { %v355_v6 = vpop.permute.xlu0 %354 }
 0x112   : > { %vm356_vm1 = vcmp.eq.s32.totalorder %v355_v6, 1 }
 0x113   : > { %v365_v7 = vsel %vm356_vm1, %v569_v4, %v570_v3 }
 0x114   : > { %v367_v8 = vadd.f32 %v366_v5, %v365_v7 }
 0x115 LB: >> { %s375_s13 = scalar_lea.sflag [#allocation3], %s1136_s12  ;;  %s830_s28 = sphi %s828_s28, %s374_s28  }
 0x116   : >> { %790 = dma.done.wait %s375_s13, 16 }
 0x117   : >> { %791 = vsyncadd %s375_s13, 4294967280  ;;  %s374_s28 = sadd.s32 1, %s830_s28  }
 0x118   : >> { %p371_p13 = scmp.ge.s32.totalorder %s374_s28, 8  }
 0x119   : > { %s379_s26 = scalar_lea.vmem (%p371_p13), [#allocation2], %s571_s6  ;;  %v572_v19 = vld [vmem:[%s1086_s5] ss:$0 sm:$0xff] (%p371_p13)  ;;  %s1115_s22 = sld [smem:[#allocation25_spill]] (%p371_p13) }
 0x11a   : > { %373 = sbr.rel (!%p371_p13) target bundleno = 277 (0x115), region = 145  ;;  %v380_v9 = vld [vmem:[%s379_s26] sm:$0xff] (%p371_p13)  ;;  %s575_s24 = sshll.u32 (%p371_p13), %s810_s8, 7 }
 0x11b   : > { %v381_v10 = vadd.f32 (%p371_p13), %v380_v9, %v367_v8  ;;  %s1116_s25 = scalar_lea.vmem (%p371_p13), [#allocation6], %s939_s20  ;;  %s1117_s9 = sld [smem:[#allocation26_spill]] (%p371_p13) }
 0x11c   : > { %s426_s14 = sshll.u32 (%p371_p13), %s1116_s25, 4  ;;  %s1119_s6 = smov (%p371_p13), %s1116_s25  ;;  %s1032_s14 = int_to_ptr.vmem [resolvable:$true] %s426_s14 }
 0x11d   : > { %382 = vadd.xlane.f32.xlu0 (%p371_p13), %v381_v10  ;;  %s1120_s7 = sand.u32 (%p371_p13), 1, %s802_s30   ;;  %s724_s29 = scalar_lea.vmem (%p371_p13), %s1032_s14, 128 }
 0x11e   : > { %s412_s10 = scalar_lea.sflag (%p371_p13), [#allocation7], %s1120_s7  ;;  %p725_p7 = scmp.ne.s32.totalorder (%p371_p13), %s1032_s14, %s724_s29 }
 0x11f   : > { %v573_v21 = vld [vmem:[%s1115_s22] ss:$0 sm:$0xff] (%p371_p13)  ;;  %s836_s8 = smov (%p371_p13), [#allocation6]  }
 0x120   : > { %p726_p8 = pnand (%p371_p13), %p725_p7, %p920_p9  ;;  %s728_s0 = sshll.u32 (%p371_p13), %s836_s8, 4  ;;  %s729_s0 = int_to_ptr.vmem [resolvable:$false] %s728_s0 }
 0x121   : > { %s1118_s17 = smov %s1117_s9  ;;  %s1030_s16 = scalar_lea.hbm %s1117_s9, %s575_s24 }
 0x122   : > { %p727_p10 = pneg %p726_p8  ;;  %s730_s1 = scalar_lea.vmem %s729_s0, 256 }
 0x123   : > { %p731_p11 = scmp.lt.s32.totalorder %s1032_s14, %s729_s0  ;;  %p732_p12 = scmp.lt.s32.totalorder %s730_s1, %s724_s29 }
 0x125   : > { %p733_p0 = por %p732_p12, %p731_p11 }
 0x127   : > { %p734_p1 = pnand %p733_p0, %p727_p10 }
 0x1aa   : > { %v383_v11 = vpop.xlane.xlu0 %382 }
 0x1ab   : > { %v385_v12 = vmul.f32 0.0078125, %v383_v11 }
 0x1ad   : > { %v386_v13 = vsub.f32 %v381_v10, %v385_v12 }
 0x1af   : > { %v387_v14 = vmul.f32 %v386_v13, %v386_v13 }
 0x1b1   : > { %388 = vadd.xlane.f32.xlu0 %v387_v14 }
 0x23e   : > { %v389_v15 = vpop.xlane.xlu0 %388 }
 0x23f   : > { %v390_v16 = vmul.f32 0.0078125, %v389_v15 }
 0x241   : > { %v391_v17 = vadd.f32 1e-05, %v390_v16 }
 0x243   : > { %662 = vrsqrt.f32 %v391_v17 }
 0x24d   : > { %v663_v18 = vpop.eup %662 }
 0x24e   : > { %v393_v20 = vmul.f32 %v663_v18, %v386_v13 }
 0x250   : > { %v401_v22 = vmul.f32 %v572_v19, %v393_v20 }
 0x252   : > { %v409_v23 = vadd.f32 %v573_v21, %v401_v22 }
 0x254   : > { %410 = vst [vmem:[%s1119_s6] sm:$0xff] %v409_v23 }
 0x255   : > { %737 = shalt.err (!%p734_p1)
}
 0x256   : > { %s738_s20 = scalar_lea.hbm %s1030_s16, 128  ;;  %s742_s13 = scalar_lea.hbm %s1118_s17, 256 }
 0x257   : > { %p739_p2 = scmp.ne.s32.totalorder %s1030_s16, %s738_s20  ;;  %p743_p5 = scmp.lt.u32.totalorder %s1030_s16, %s1118_s17 }
 0x258   : > { %p744_p6 = scmp.lt.u32.totalorder %s742_s13, %s738_s20  ;;  %p746_p7 = scmp.lt.u32.totalorder %s738_s20, %s1030_s16 }
 0x259   : > { %p740_p3 = pnand %p739_p2, %p920_p9 }
 0x25a   : > { %p745_p13 = por %p744_p6, %p743_p5 }
 0x25b   : > { %p741_p4 = pneg %p740_p3 }
 0x25c   : > { %p747_p8 = por %p746_p7, %p745_p13 }
 0x25e   : > { %p748_p10 = pnand %p747_p8, %p741_p4 }
 0x260   : > { %751 = shalt.err (!%p748_p10)
}
 0x261   : > { %580 = dma.vmem_to_hbm [thread:$0]  (%p920_p9), %s1032_s14, 128, %s1030_s16, %s412_s10  }
 0x262 PF: > { %s1121_s12 = sld [smem:[#allocation20_spill]]  ;;  %s1122_s11 = sld [smem:[#allocation17_spill]] }
 0x263   : > { %s1123_s21 = sld [smem:[#allocation22_spill]] }
 0x268   : > { %p586_p11 = scmp.ge.s32.totalorder %s1121_s12, 2  ;;  %s438_s22 = sand.u32 1, %s1122_s11  }
 0x269   : > { %p1124_p12 = scmp.ne.s32.totalorder %s1123_s21, 0  ;;  %s439_s24 = scalar_lea.sflag [#allocation7], %s438_s22 }
 0x26b   : > { %p583_p0 = pnand %p586_p11, %p1124_p12 }
 0x26d   : > { %793 = dma.done.wait (!%p583_p0), %s439_s24, 128  }
 0x26e   : > { %795 = vsyncadd (!%p583_p0), %s439_s24, 4294967168  ;;  %s26_s10 = sadd.s32 1, %s1121_s12   ;;  %s1125_s25 = sld [smem:[#allocation18_spill]] }
 0x26f   : > { %p23_p1 = scmp.ge.s32.totalorder %s26_s10, 4   ;;  %s1126_s0 = sld [smem:[#allocation23_spill]] }
 0x270   : > { %s1127_s8 = sld [smem:[#allocation19_spill]]  ;;  %s1128_s9 = sld [smem:[#allocation21_spill]] }
 0x271   : > { %s1129_s29 = smov %s802_s30  ;;  %25 = sbr.rel (!%p23_p1) target bundleno = 20 (0x14), region = 156 }
 0x274   : > { %s1130_s30 = smov %s1125_s25 }
 0x278   :  { %444 = vsyncpa [#allocation7], 1 }
 0x279   :  { %446 = vsyncpa [#allocation7 + $0x1], 1 }
 0x27a   :  { %447 = vsyncmov [#allocation3] }
 0x27d   :  { %s448_s15 = vpop.sfrf %447 }
 0x27e   :  { %p578_p9 = scmp.ne.s32.totalorder %s448_s15, 0 }
 0x280   :  { %452 = shalt.err (%p578_p9)  }
 0x281   :  { %454 = vsyncmov [#allocation3 + $0x1] }
 0x284   :  { %s455_s14 = vpop.sfrf %454 }
 0x285   :  { %p579_p2 = scmp.ne.s32.totalorder %s455_s14, 0 }
 0x287   :  { %459 = shalt.err (%p579_p2)  }

</bundles_post_ra>
